<compile_context>
chip_gen: v6e
topology: v6e:2x2x1
jax: 0.10.0
libtpu: 0.0.40
codegen_flags: <defaults>
</compile_context>

<pallas_src>
import math
import functools

import jax
import jax.numpy as jnp
from jax import lax
from jax.experimental import pallas as pl
from jax.experimental.pallas import tpu as pltpu


def _pair(v):
    if isinstance(v, int):
        return [v, v]
    v = list(v)
    if len(v) == 1:
        return [v[0], v[0]]
    return v[:2]


def _same_padding(h, w, kh, kw, sh, sw):
    """Exact same-padding arithmetic of the PyTorch forward()."""
    extra_h = (math.ceil(w / sw) - 1) * sw - w + kw
    extra_v = (math.ceil(h / sh) - 1) * sh - h + kh
    left = extra_h // 2
    right = extra_h - left
    top = extra_v // 2
    bottom = extra_v - top
    return top, bottom, left, right


def _largest_divisor_leq(n, cap):
    cap = max(1, min(cap, n))
    for d in range(cap, 0, -1):
        if n % d == 0:
            return d
    return 1


def _maxpool_kernel(x_ref, o_ref, *scratch, kh, kw, sh, sw, oh, ow,
                    h, w, hp, wp, pads, needs_pad):
    """Pool one (c_tile, H, W) NCHW block into (c_tile, OH, OW).

    scratch = (xp_ref, t_ref) when padding is needed, else (t_ref,).
      xp_ref: (c_tile, Hp, Wp) zero-padded copy of the block (VMEM only).
      t_ref : (c_tile, Wp, OH) row-max with W moved onto the sublane axis so
              the W window/stride is a sublane-strided read (never lane-strided).
    """
    if needs_pad:
        xp_ref, t_ref = scratch
        top, _, left, _ = pads
        # nn.ZeroPad2d: zeros participate in the max; negative pads crop.
        xp_ref[...] = jnp.zeros_like(xp_ref)
        dh0 = max(top, 0)
        dh1 = min(top + h, hp)
        dw0 = max(left, 0)
        dw1 = min(left + w, wp)
        xp_ref[:, dh0:dh1, dw0:dw1] = x_ref[:, dh0 - top:dh1 - top,
                                            dw0 - left:dw1 - left]
        src = xp_ref
    else:
        (t_ref,) = scratch
        src = x_ref

    c_tile = o_ref.shape[0]

    # H direction: kh sublane-strided reads, running max on the VPU.
    rmax = src[:, pl.ds(0, oh, sh), :]
    for i in range(1, kh):
        rmax = jnp.maximum(rmax, src[:, pl.ds(i, oh, sh), :])

    # Move W to the sublane axis (2-D XLU transposes, a free-ish slot) so the
    # W-direction window + stride are sublane-strided reads as well.
    for ci in range(c_tile):
        t_ref[ci] = rmax[ci].T

    cmax = t_ref[:, pl.ds(0, ow, sw), :]
    for j in range(1, kw):
        cmax = jnp.maximum(cmax, t_ref[:, pl.ds(j, ow, sw), :])

    for ci in range(c_tile):
        o_ref[ci] = cmax[ci].T.astype(o_ref.dtype)


class MaxPool2dStaticSamePadding:
    """JAX/Pallas port of the PyTorch MaxPool2dStaticSamePadding module."""

    # ~8 MiB per grid step (double-buffered input/output + scratch): fits the
    # v5e 16 MiB scoped default and v7x's 64 MiB physical VMEM with headroom.
    _VMEM_BUDGET_BYTES = 8 * 1024 * 1024
    _MAX_C_TILE = 32   # bounds the unrolled per-channel transpose loop

    def __init__(self, kernel_size, stride=None):
        # nn.MaxPool2d: stride defaults to kernel_size when not given.
        if stride is None:
            stride = kernel_size
        self.kernel_size = _pair(kernel_size)
        self.stride = _pair(stride)

    def __call__(self, x):
        n, c, h, w = x.shape          # NCHW, kept end-to-end (no transposes)
        kh, kw = self.kernel_size
        sh, sw = self.stride

        top, bottom, left, right = _same_padding(h, w, kh, kw, sh, sw)
        needs_pad = any(p != 0 for p in (top, bottom, left, right))
        hp = h + top + bottom
        wp = w + left + right
        oh = (hp - kh) // sh + 1       # ceil_mode=False
        ow = (wp - kw) // sw + 1

        itemsize = jnp.dtype(x.dtype).itemsize
        # Per-channel VMEM: in + out (double-buffered) + scratch buffers.
        per_chan = itemsize * (2 * h * w + 2 * oh * ow + wp * oh
                               + (hp * wp if needs_pad else 0))
        c_budget = max(1, self._VMEM_BUDGET_BYTES // per_chan)
        # Keep >=2 channel blocks when possible so the grid still pipelines and
        # shards across the two v7x TensorCores even at batch=1.
        split_cap = (c + 1) // 2 if c > 1 else 1
        c_tile = _largest_divisor_leq(c, min(c_budget, self._MAX_C_TILE,
                                             split_cap))
        c_blocks = c // c_tile

        kernel = functools.partial(
            _maxpool_kernel, kh=kh, kw=kw, sh=sh, sw=sw, oh=oh, ow=ow,
            h=h, w=w, hp=hp, wp=wp, pads=(top, bottom, left, right),
            needs_pad=needs_pad)

        scratch_shapes = []
        if needs_pad:
            scratch_shapes.append(pltpu.VMEM((c_tile, hp, wp), x.dtype))
        scratch_shapes.append(pltpu.VMEM((c_tile, wp, oh), x.dtype))

        cost = pl.CostEstimate(
            flops=n * c * oh * ow * kh * kw,
            transcendentals=0,
            bytes_accessed=(n * c * h * w + n * c * oh * ow) * itemsize)

        return pl.pallas_call(
            kernel,
            out_shape=jax.ShapeDtypeStruct((n, c, oh, ow), x.dtype),
            grid_spec=pltpu.PrefetchScalarGridSpec(
                num_scalar_prefetch=0,
                grid=(n, c_blocks),
                in_specs=[
                    # (1, c_tile, H, W) NCHW slab: contiguous in HBM, batch dim
                    # squeezed; padding handled inside the kernel.
                    pl.BlockSpec((None, c_tile, h, w),
                                 lambda b, ci: (b, ci, 0, 0)),
                ],
                out_specs=pl.BlockSpec((None, c_tile, oh, ow),
                                       lambda b, ci: (b, ci, 0, 0)),
                scratch_shapes=scratch_shapes),
            compiler_params=pltpu.CompilerParams(
                dimension_semantics=("parallel", "parallel"),
                vmem_limit_bytes=32 * 1024 * 1024),
            cost_estimate=cost,
        )(x)


def _reference_maxpool_same(x, kernel_size, stride):
    """Pure-JAX reference (NCHW), mirroring the PyTorch module exactly."""
    kh, kw = _pair(kernel_size)
    sh, sw = _pair(stride)
    n, c, h, w = x.shape
    top, bottom, left, right = _same_padding(h, w, kh, kw, sh, sw)
    xp = jnp.pad(x, ((0, 0), (0, 0), (top, bottom), (left, right)))
    return lax.reduce_window(
        xp,
        -jnp.inf,
        lax.max,
        window_dimensions=(1, 1, kh, kw),
        window_strides=(1, 1, sh, sw),
        padding="VALID",
    )


if __name__ == "__main__":
    key = jax.random.PRNGKey(0)

    configs = [
        # (batch, channels, H, W, kernel_size, stride)
        (2, 4, 16, 16, 3, 2),   # canonical EfficientDet downsample pool
        (1, 6, 15, 17, 3, 2),   # odd spatial sizes -> pad on all sides, batch=1
        (2, 4, 16, 16, 2, 2),   # zero padding needed (Identity branch)
    ]
    for (bn, bc, bh, bw, ks, st) in configs:
        key, sub = jax.random.split(key)
        x = jax.random.normal(sub, (bn, bc, bh, bw), dtype=jnp.float32)
        pool = MaxPool2dStaticSamePadding(ks, st)
        out = jax.block_until_ready(pool(x))
        ref = _reference_maxpool_same(x, ks, st)
        assert out.shape == ref.shape, (out.shape, ref.shape)
        assert jnp.allclose(out, ref), f"mismatch for config {(bn, bc, bh, bw, ks, st)}"

    print("KERNEL_OK")
</pallas_src>

<mosaic_0001>
module attributes {stable_mosaic.version = 11 : i64} {
  func.func @_maxpool_kernel(%arg0: i32, %arg1: i32, %arg2: memref<1x2x16x16xf32, #tpu.memory_space<vmem>>, %arg3: memref<1x2x8x8xf32, #tpu.memory_space<vmem>>, %arg4: memref<2x17x17xf32, #tpu.memory_space<vmem>>, %arg5: memref<2x17x8xf32, #tpu.memory_space<vmem>>) attributes {dimension_semantics = [#tpu.dimension_semantics<parallel>, #tpu.dimension_semantics<parallel>], iteration_bounds = array<i64: 2, 2>, scalar_prefetch = 0 : i64, scratch_operands = 2 : i64, tpu.core_type = #tpu.core_type<tc>, window_params = [{transform_indices = @transform_0, window_bounds = array<i64: 1, 2, 16, 16>}, {transform_indices = @transform_1, window_bounds = array<i64: 1, 2, 8, 8>}]} {
    %cst = arith.constant 0.000000e+00 : f32
    %0 = vector.broadcast %cst : f32 to vector<2x17x17xf32>
    %c0 = arith.constant 0 : index
    %c0_0 = arith.constant 0 : index
    %c0_1 = arith.constant 0 : index
    %1 = vector.load %arg4[%c0, %c0_0, %c0_1] : memref<2x17x17xf32, #tpu.memory_space<vmem>>, vector<2x17x17xf32>
    tpu.vector_store %arg4[%c0, %c0_0, %c0_1], %0 {strides = array<i32>} : memref<2x17x17xf32, #tpu.memory_space<vmem>>, vector<2x17x17xf32>,
    %c0_2 = arith.constant 0 : index
    %c0_3 = arith.constant 0 : index
    %c0_4 = arith.constant 0 : index
    %c0_5 = arith.constant 0 : index
    %2 = vector.load %arg2[%c0_2, %c0_3, %c0_4, %c0_5] : memref<1x2x16x16xf32, #tpu.memory_space<vmem>>, vector<1x2x16x16xf32>
    %3 = vector.shape_cast %2 : vector<1x2x16x16xf32> to vector<2x16x16xf32>
    %c0_6 = arith.constant 0 : index
    %c0_7 = arith.constant 0 : index
    %c0_8 = arith.constant 0 : index
    %4 = vector.load %arg4[%c0_6, %c0_7, %c0_8] : memref<2x17x17xf32, #tpu.memory_space<vmem>>, vector<2x16x16xf32>
    tpu.vector_store %arg4[%c0_6, %c0_7, %c0_8], %3 {strides = array<i32>} : memref<2x17x17xf32, #tpu.memory_space<vmem>>, vector<2x16x16xf32>,
    %c0_9 = arith.constant 0 : index
    %c0_10 = arith.constant 0 : index
    %c0_11 = arith.constant 0 : index
    %5 = tpu.strided_load %arg4[%c0_9, %c0_10, %c0_11] {strides = array<i32: 1, 2, 1>} : memref<2x17x17xf32, #tpu.memory_space<vmem>>, vector<2x8x17xf32>
    %c0_12 = arith.constant 0 : index
    %c1 = arith.constant 1 : index
    %c0_13 = arith.constant 0 : index
    %6 = tpu.strided_load %arg4[%c0_12, %c1, %c0_13] {strides = array<i32: 1, 2, 1>} : memref<2x17x17xf32, #tpu.memory_space<vmem>>, vector<2x8x17xf32>
    %7 = arith.maximumf %5, %6 : vector<2x8x17xf32>
    %c0_14 = arith.constant 0 : index
    %c2 = arith.constant 2 : index
    %c0_15 = arith.constant 0 : index
    %8 = tpu.strided_load %arg4[%c0_14, %c2, %c0_15] {strides = array<i32: 1, 2, 1>} : memref<2x17x17xf32, #tpu.memory_space<vmem>>, vector<2x8x17xf32>
    %9 = arith.maximumf %7, %8 : vector<2x8x17xf32>
    %10 = vector.extract_strided_slice %9 {offsets = [0, 0, 0], sizes = [1, 8, 17], strides = [1, 1, 1]} : vector<2x8x17xf32> to vector<1x8x17xf32>
    %11 = vector.shape_cast %10 : vector<1x8x17xf32> to vector<8x17xf32>
    %12 = tpu.transpose %11, [1, 0] : vector<8x17xf32> -> vector<17x8xf32>
    %c0_16 = arith.constant 0 : index
    %c0_17 = arith.constant 0 : index
    %c0_18 = arith.constant 0 : index
    %13 = vector.load %arg5[%c0_16, %c0_17, %c0_18] : memref<2x17x8xf32, #tpu.memory_space<vmem>>, vector<1x17x8xf32>
    %14 = vector.shape_cast %13 : vector<1x17x8xf32> to vector<17x8xf32>
    %15 = vector.shape_cast %12 : vector<17x8xf32> to vector<1x17x8xf32>
    tpu.vector_store %arg5[%c0_16, %c0_17, %c0_18], %15 {strides = array<i32>} : memref<2x17x8xf32, #tpu.memory_space<vmem>>, vector<1x17x8xf32>,
    %16 = vector.extract_strided_slice %9 {offsets = [1, 0, 0], sizes = [1, 8, 17], strides = [1, 1, 1]} : vector<2x8x17xf32> to vector<1x8x17xf32>
    %17 = vector.shape_cast %16 : vector<1x8x17xf32> to vector<8x17xf32>
    %18 = tpu.transpose %17, [1, 0] : vector<8x17xf32> -> vector<17x8xf32>
    %c1_19 = arith.constant 1 : index
    %c0_20 = arith.constant 0 : index
    %c0_21 = arith.constant 0 : index
    %19 = vector.load %arg5[%c1_19, %c0_20, %c0_21] : memref<2x17x8xf32, #tpu.memory_space<vmem>>, vector<1x17x8xf32>
    %20 = vector.shape_cast %19 : vector<1x17x8xf32> to vector<17x8xf32>
    %21 = vector.shape_cast %18 : vector<17x8xf32> to vector<1x17x8xf32>
    tpu.vector_store %arg5[%c1_19, %c0_20, %c0_21], %21 {strides = array<i32>} : memref<2x17x8xf32, #tpu.memory_space<vmem>>, vector<1x17x8xf32>,
    %c0_22 = arith.constant 0 : index
    %c0_23 = arith.constant 0 : index
    %c0_24 = arith.constant 0 : index
    %22 = tpu.strided_load %arg5[%c0_22, %c0_23, %c0_24] {strides = array<i32: 1, 2, 1>} : memref<2x17x8xf32, #tpu.memory_space<vmem>>, vector<2x8x8xf32>
    %c0_25 = arith.constant 0 : index
    %c1_26 = arith.constant 1 : index
    %c0_27 = arith.constant 0 : index
    %23 = tpu.strided_load %arg5[%c0_25, %c1_26, %c0_27] {strides = array<i32: 1, 2, 1>} : memref<2x17x8xf32, #tpu.memory_space<vmem>>, vector<2x8x8xf32>
    %24 = arith.maximumf %22, %23 : vector<2x8x8xf32>
    %c0_28 = arith.constant 0 : index
    %c2_29 = arith.constant 2 : index
    %c0_30 = arith.constant 0 : index
    %25 = tpu.strided_load %arg5[%c0_28, %c2_29, %c0_30] {strides = array<i32: 1, 2, 1>} : memref<2x17x8xf32, #tpu.memory_space<vmem>>, vector<2x8x8xf32>
    %26 = arith.maximumf %24, %25 : vector<2x8x8xf32>
    %27 = vector.extract_strided_slice %26 {offsets = [0, 0, 0], sizes = [1, 8, 8], strides = [1, 1, 1]} : vector<2x8x8xf32> to vector<1x8x8xf32>
    %28 = vector.shape_cast %27 : vector<1x8x8xf32> to vector<8x8xf32>
    %29 = tpu.transpose %28, [1, 0] : vector<8x8xf32> -> vector<8x8xf32>
    %c0_31 = arith.constant 0 : index
    %c0_32 = arith.constant 0 : index
    %c0_33 = arith.constant 0 : index
    %c0_34 = arith.constant 0 : index
    %30 = vector.load %arg3[%c0_31, %c0_32, %c0_33, %c0_34] : memref<1x2x8x8xf32, #tpu.memory_space<vmem>>, vector<1x1x8x8xf32>
    %31 = vector.shape_cast %30 : vector<1x1x8x8xf32> to vector<8x8xf32>
    %32 = vector.shape_cast %29 : vector<8x8xf32> to vector<1x1x8x8xf32>
    tpu.vector_store %arg3[%c0_31, %c0_32, %c0_33, %c0_34], %32 {strides = array<i32>} : memref<1x2x8x8xf32, #tpu.memory_space<vmem>>, vector<1x1x8x8xf32>,
    %33 = vector.extract_strided_slice %26 {offsets = [1, 0, 0], sizes = [1, 8, 8], strides = [1, 1, 1]} : vector<2x8x8xf32> to vector<1x8x8xf32>
    %34 = vector.shape_cast %33 : vector<1x8x8xf32> to vector<8x8xf32>
    %35 = tpu.transpose %34, [1, 0] : vector<8x8xf32> -> vector<8x8xf32>
    %c0_35 = arith.constant 0 : index
    %c1_36 = arith.constant 1 : index
    %c0_37 = arith.constant 0 : index
    %c0_38 = arith.constant 0 : index
    %36 = vector.load %arg3[%c0_35, %c1_36, %c0_37, %c0_38] : memref<1x2x8x8xf32, #tpu.memory_space<vmem>>, vector<1x1x8x8xf32>
    %37 = vector.shape_cast %36 : vector<1x1x8x8xf32> to vector<8x8xf32>
    %38 = vector.shape_cast %35 : vector<8x8xf32> to vector<1x1x8x8xf32>
    tpu.vector_store %arg3[%c0_35, %c1_36, %c0_37, %c0_38], %38 {strides = array<i32>} : memref<1x2x8x8xf32, #tpu.memory_space<vmem>>, vector<1x1x8x8xf32>,
    return
  }
  func.func @transform_0(%arg0: i32, %arg1: i32) -> (i32, i32, i32, i32) {
    %c0_i32 = arith.constant 0 : i32
    %c0_i32_0 = arith.constant 0 : i32
    %c0_i32_1 = arith.constant 0 : i32
    return %arg0, %arg1, %c0_i32, %c0_i32_0 : i32, i32, i32, i32
  }
  func.func @transform_1(%arg0: i32, %arg1: i32) -> (i32, i32, i32, i32) {
    %c0_i32 = arith.constant 0 : i32
    %c0_i32_0 = arith.constant 0 : i32
    %c0_i32_1 = arith.constant 0 : i32
    return %arg0, %arg1, %c0_i32, %c0_i32_0 : i32, i32, i32, i32
  }
}

</mosaic_0001>

<bundles_post_ra>
// kernel: tpu_custom_call.1
= control target key start
LH: loop header
LB: loop body
LE: loop exit
PB: predicated region body
PF: predicated region fallthrough
CT: control target
= control target key end

     0   :  { %6 = vsyncpa [#allocation5], 0  ;;  %s868_s0 = inlined_call_operand.hbm [shape: f32[2,4,16,16], index: 0, kind: input, shape index: {}]   ;;  %s869_s1 = inlined_call_operand.hbm [shape: f32[2,4,8,8], index: 1, kind: output, shape index: {}]  }
   0x1   :  { %8 = vsyncpa [#allocation5 + $0x1], 0 }
   0x2   :  { %9 = vsyncpa [#allocation6], 0 }
   0x3   :  { %11 = vsyncpa [#allocation6 + $0x1], 0  ;;  %s695_s6 = smov 0   ;;  %s697_s7 = smov 0  }
   0x4   :  { %s699_s8 = smov 0   ;;  %s701_s9 = smov 0  }
   0x5   :  { %s703_s10 = smov 0   ;;  %s705_s11 = smov 0  }
   0x6   :  { %s707_s12 = smov 0   ;;  %s709_s13 = smov 0  }
   0x7 LB: > { %s449_s14 = sadd.s32 4294967295, %s676_s13   ;;  %s450_s15 = sadd.s32 4294967294, %s676_s13   ;;  %s676_s13 = sphi %s709_s13, %s17_s13   ;;  %s672_s12 = sphi %s707_s12, %s881_s12   ;;  %s668_s11 = sphi %s705_s11, %s880_s11   ;;  %s664_s10 = sphi %s703_s10, %s879_s10   ;;  %s660_s9 = sphi %s701_s9, %s878_s9   ;;  %s656_s8 = sphi %s699_s8, %s877_s8   ;;  %s652_s7 = sphi %s697_s7, %s876_s7   ;;  %s648_s6 = sphi %s695_s6, %s875_s6  }
   0x8   : > { %s26_s16 = sadd.s32 1, %s668_s11  ;;  %s29_s17 = sadd.s32 1, %s672_s12 }
   0x9   : > { %p27_p0 = scmp.ge.s32.totalorder %s26_s16, 2  ;;  %s38_s18 = sadd.s32 1, %s656_s8 }
   0xa   : > { %p45_p1 = scmp.ne.s32.totalorder %s656_s8, %s652_s7  ;;  %p46_p2 = scmp.eq.s32.totalorder %s676_s13, 0 }
   0xb   : > { %s883_s16 = smov (%p27_p0, %s26_s16), 0  ;;  %s885_s17 = smov (!%p27_p0, %s29_s17), %s672_s12 }
   0xc   : > { %s34_s19 = ssub.s32 %s668_s11, %s883_s16  ;;  %p748_p3 = por %p46_p2, %p45_p1 }
   0xd   : > { %p31_p4 = scmp.ge.s32.totalorder %s885_s17, 2  ;;  %p51_p5 = scmp.ne.s32.totalorder %s652_s7, %s648_s6 }
   0xe   : > { %p52_p6 = scmp.eq.s32.totalorder %s449_s14, 0  ;;  %p77_p7 = scmp.eq.s32.totalorder %s449_s14, 3 }
   0xf   : > { %s887_s17 = smov (%p31_p4, %s885_s17), 0  ;;  %p83_p10 = scmp.eq.s32.totalorder %s450_s15, 3 }
  0x10   : > { %p756_p8 = por %p52_p6, %p51_p5  ;;  %p760_p9 = por %p77_p7, %p45_p1 }
  0x11   : > { %s33_s23 = ssub.s32 %s672_s12, %s887_s17  ;;  %p766_p12 = por %p83_p10, %p51_p5 }
  0x12   : > { %s35_s24 = sor.u32 %s34_s19, %s33_s23  ;;  %p481_p13 = scmp.lt.s32.totalorder %s676_s13, 4 }
  0x13   : > { %p36_p11 = scmp.eq.s32.totalorder %s35_s24, 0  ;;  %s103_s26 = sand.u32 1, %s656_s8  }
  0x14   : > { %s453_s28 = sshll.u32 %s103_s26, 5  ;;  %s468_s29 = sshll.u32 %s668_s11, 2 }
  0x15   : > { %s773_s27 = scalar_select %p36_p11, %s656_s8, %s38_s18  }
  0x16   : > { %s456_s30 = sshll.u32 %s672_s12, 3  ;;  %s107_s2 = scalar_lea.vmem [#allocation4], %s453_s28 }
  0x17   : > { %s117_s3 = sshll.u32 %s107_s2, 4  ;;  %s114_s4 = sadd.s32 %s468_s29, %s456_s30  ;;  %s118_s3 = int_to_ptr.vmem [resolvable:$true] %s117_s3 }
  0x18   : > { %s457_s5 = sshll.u32 %s114_s4, 7  ;;  %p779_p0 = pnand %p481_p13, %p748_p3 }
  0x19   : > { %s116_s23 = scalar_lea.hbm %s868_s0, %s457_s5  ;;  %s104_s18 = scalar_lea.sflag [#allocation5], %s103_s26 }
  0x1a   : > { %p554_p1 = pneg %p779_p0  ;;  %s565_s24 = scalar_lea.vmem %s118_s3, 512 }
  0x1b   : > { %p566_p2 = scmp.ne.s32.totalorder %s118_s3, %s565_s24  ;;  %s678_s28 = smov [#allocation4]  }
  0x1c   : > { %s570_s29 = sshll.u32 %s678_s28, 4  ;;  %s571_s29 = int_to_ptr.vmem [resolvable:$false] %s570_s29 }
  0x1d   : > { %p568_p4 = pnand %p566_p2, %p554_p1  ;;  %s572_s20 = scalar_lea.vmem %s571_s29, 1024 }
  0x1e   : > { %p573_p3 = scmp.lt.s32.totalorder %s118_s3, %s571_s29  ;;  %p574_p6 = scmp.lt.s32.totalorder %s572_s20, %s565_s24 }
  0x1f   : > { %p569_p5 = pneg %p568_p4 }
  0x20   : > { %p575_p7 = por %p574_p6, %p573_p3 }
  0x22   : > { %p576_p10 = pnand %p575_p7, %p569_p5 }
  0x24   : > { %579 = shalt.err (!%p576_p10)
}
  0x25   : > { %s679_s30 = smov 128   ;;  %s680_s26 = smov 8  }
  0x26   : > { %476 = dma.hbm_to_vmem [thread:$0]  (!%p779_p0), %s116_s23, 512, %s118_s3, %s104_s18, %s679_s30, %s679_s30, %s680_s26  }
  0x27   : > { %p458_p11 = scmp.ge.s32.totalorder %s676_s13, 1  ;;  %p125_p13 = scmp.lt.s32.totalorder %s676_s13, 5 }
  0x29   : > { %p126_p1 = pnand %p458_p11, %p125_p13 }
  0x2a   : > { %s793_s2 = sand.u32 (!%p126_p1), 1, %s652_s7  }
  0x2b   : > { %129 = sbr.rel (%p126_p1) target bundleno = 359 (0x167), region = 24  ;;  %s459_s4 = sshll.u32 (!%p126_p1), %s793_s2, 5 }
  0x2c   : > { %s132_s5 = scalar_lea.sflag (!%p126_p1), [#allocation5], %s793_s2  ;;  %s135_s15 = scalar_lea.vmem (!%p126_p1), [#allocation4], %s459_s4 }
  0x30   : > { %639 = dma.done.wait (%p756_p8), %s132_s5, 512  }
  0x31   : > { %641 = vsyncadd (%p756_p8), %s132_s5, 4294966784  ;;  %vm156_vm0 = vcmask 138240   ;;  %vm159_vm1 = vcmask 131072   ;;  %v681_v0 = vmov 0.0   ;;  %vm168_vm2 = vcmask 130048   ;;  %v164_v1 = vld [vmem:[%s135_s15] sm:$0xff] }
  0x32   : > { %157 = vst.msk [vmem:[#allocation2] sm:$0xff] %vm156_vm0, %v681_v0  ;;  %158 = vst.msk [vmem:[#allocation2 + $0x8] sm:$0xff] %vm156_vm0, %v681_v0  ;;  %v165_v2 = vld [vmem:[%s135_s15 + $0x8] sm:$0xff]  ;;  %v166_v3 = vld [vmem:[%s135_s15 + $0x10] sm:$0xff]  ;;  %vm220_vm3 = vcmask 64512   ;;  %vm223_vm4 = vcmask 57344  }
  0x33   : > { %160 = vst.msk [vmem:[#allocation2 + $0x10] sm:$0x1] %vm159_vm1, %v681_v0  ;;  %163 = vst.msk [vmem:[#allocation2 + $0x28] sm:$0x1] %vm159_vm1, %v681_v0  ;;  %v167_v4 = vld [vmem:[%s135_s15 + $0x18] sm:$0xff]  ;;  %s460_s21 = sshll.u32 %s793_s2, 4 }
  0x34   : > { %161 = vst.msk [vmem:[#allocation2 + $0x18] sm:$0xff] %vm156_vm0, %v681_v0  ;;  %162 = vst.msk [vmem:[#allocation2 + $0x20] sm:$0xff] %vm156_vm0, %v681_v0  ;;  %s153_s3 = scalar_lea.vmem [#allocation7], %s460_s21  ;;  %s463_s14 = sshll.u32 %s660_s9, 1 }
  0x35   : > { %169 = vst.msk [vmem:[#allocation2] sm:$0xff] %vm168_vm2, %v164_v1  ;;  %170 = vst.msk [vmem:[#allocation2 + $0x8] sm:$0xff] %vm168_vm2, %v165_v2  ;;  %s464_s19 = sshll.u32 %s664_s10, 2  ;;  %s359_s18 = sshll.u32 %s153_s3, 4  ;;  %s809_s18 = int_to_ptr.vmem [resolvable:$true] %s359_s18 }
  0x36   : > { %171 = vst.msk [vmem:[#allocation2 + $0x18] sm:$0xff] %vm168_vm2, %v166_v3  ;;  %172 = vst.msk [vmem:[#allocation2 + $0x20] sm:$0xff] %vm168_vm2, %v167_v4  ;;  %s356_s23 = sadd.s32 %s464_s19, %s463_s14  ;;  %s344_s30 = scalar_lea.sflag [#allocation6], %s793_s2 }
  0x37   : > { %s465_s24 = sshll.u32 %s356_s23, 7  ;;  %s580_s26 = scalar_lea.vmem %s809_s18, 256 }
  0x38   : > { %s814_s20 = scalar_lea.hbm %s869_s1, %s465_s24  ;;  %p581_p8 = scmp.ne.s32.totalorder %s809_s18, %s580_s26 }
  0x39   : > { %s682_s9 = smov [#allocation7]  }
  0x3a   : > { %p582_p0 = pnand %p581_p8, %p760_p9  ;;  %s584_s10 = sshll.u32 %s682_s9, 4  ;;  %s585_s10 = int_to_ptr.vmem [resolvable:$false] %s584_s10 }
  0x3b   : > { %s586_s4 = scalar_lea.vmem %s585_s10, 512  ;;  %p587_p4 = scmp.lt.s32.totalorder %s809_s18, %s585_s10 }
  0x3c   : > { %v173_v5 = vld [vmem:[#allocation2] ss:$2 sm:$0xff]  ;;  %v177_v6 = vld [vmem:[#allocation2 + $0x1] ss:$2 sm:$0xff]  ;;  %p583_p2 = pneg %p582_p0  ;;  %p588_p5 = scmp.lt.s32.totalorder %s586_s4, %s580_s26 }
  0x3d   : > { %v183_v7 = vld [vmem:[#allocation2 + $0x2] ss:$2 sm:$0xff]  ;;  %v180_v8 = vmax.f32 %v173_v5, %v177_v6  ;;  %v179_v11 = vld [vmem:[#allocation2 + $0x19] ss:$2 sm:$0xff] }
  0x3e   : > { %v175_v10 = vld [vmem:[#allocation2 + $0x18] ss:$2 sm:$0xff]  ;;  %p589_p3 = por %p588_p5, %p587_p4 }
  0x3f   : > { %v186_v9 = vmax.f32 %v180_v8, %v183_v7  ;;  %v181_v12 = vmax.f32 %v175_v10, %v179_v11  ;;  %v185_v13 = vld [vmem:[#allocation2 + $0x1a] ss:$2 sm:$0xff] }
  0x40   : > { %p590_p6 = pnand %p589_p3, %p583_p2 }
  0x41   : > { %188 = vxpose.xlu0.b32.start.end [1/1] (short) (narrow) %v186_v9, 24  ;;  %v187_v14 = vmax.f32 %v181_v12, %v185_v13 }
  0x4a   : > { %225 = vxpose.xlu0.b32.start.end [1/1] (short) (narrow) %v187_v14, 24 }
  0xbd   : > { %v204_v15 = vpop.trf.xlu0 }
  0xbe   : > { %221 = vst.msk [vmem:[#allocation3] sm:$0xff] %vm220_vm3, %v204_v15 }
  0xc1   : > { %v205_v16 = vpop.trf.xlu0 }
  0xc2   : > { %222 = vst.msk [vmem:[#allocation3 + $0x8] sm:$0xff] %vm220_vm3, %v205_v16 }
  0xc5   : > { %v206_v17 = vpop.trf.xlu0 }
  0xc6   : > { %224 = vst.msk [vmem:[#allocation3 + $0x10] sm:$0x1] %vm223_vm4, %v206_v17 }
  0xc9   : > { %v241_v18 = vpop.trf.xlu0  ;;  %v261_v19 = vld [vmem:[#allocation3] ss:$2 sm:$0xff]  ;;  %v265_v20 = vld [vmem:[#allocation3 + $0x1] ss:$2 sm:$0xff] }
  0xca   : > { %258 = vst.msk [vmem:[#allocation3 + $0x18] sm:$0xff] %vm220_vm3, %v241_v18  ;;  %v268_v21 = vmax.f32 %v261_v19, %v265_v20 }
  0xcd   : > { %v242_v22 = vpop.trf.xlu0  ;;  %v271_v23 = vld [vmem:[#allocation3 + $0x2] ss:$2 sm:$0xff] }
  0xce   : > { %259 = vst.msk [vmem:[#allocation3 + $0x20] sm:$0xff] %vm220_vm3, %v242_v22  ;;  %v274_v24 = vmax.f32 %v268_v21, %v271_v23 }
  0xd0   : > { %276 = vxpose.xlu1.b32.start.end [1/1] (short) (narrow) %v274_v24, 8 }
  0xd1   : > { %v243_v25 = vpop.trf.xlu0 }
  0xd2   : > { %260 = vst.msk [vmem:[#allocation3 + $0x28] sm:$0x1] %vm223_vm4, %v243_v25 }
  0xd5   : > { %v263_v26 = vld [vmem:[#allocation3 + $0x18] ss:$2 sm:$0xff]  ;;  %v267_v27 = vld [vmem:[#allocation3 + $0x19] ss:$2 sm:$0xff] }
  0xd6   : > { %v269_v28 = vmax.f32 %v263_v26, %v267_v27 }
  0xd9   : > { %v273_v29 = vld [vmem:[#allocation3 + $0x1a] ss:$2 sm:$0xff] }
  0xda   : > { %v275_v30 = vmax.f32 %v269_v28, %v273_v29 }
  0xdc   : > { %309 = vxpose.xlu1.b32.start.end [1/1] (short) (narrow) %v275_v30, 8 }
 0x14c   : > { %v292_v31 = vpop.trf.xlu1 }
 0x14d   : > { %308 = vst.msk [vmem:[%s153_s3] sm:$0xff] %vm220_vm3, %v292_v31 }
 0x158   : > { %v325_v32 = vpop.trf.xlu1 }
 0x159   : > { %461 = vst.msk [vmem:[%s153_s3 + $0x8] sm:$0xff] %vm220_vm3, %v325_v32 }
 0x15a   : > { %593 = shalt.err (!%p590_p6)
}
 0x15b   : > { %s594_s5 = scalar_lea.hbm %s814_s20, 256  ;;  %s598_s3 = scalar_lea.hbm %s869_s1, 1024 }
 0x15c   : > { %p595_p7 = scmp.ne.s32.totalorder %s814_s20, %s594_s5  ;;  %p599_p13 = scmp.lt.s32.totalorder %s814_s20, %s869_s1 }
 0x15d   : > { %p600_p1 = scmp.lt.s32.totalorder %s598_s3, %s594_s5 }
 0x15e   : > { %p596_p10 = pnand %p595_p7, %p760_p9 }
 0x15f   : > { %p601_p8 = por %p600_p1, %p599_p13 }
 0x160   : > { %p597_p11 = pneg %p596_p10 }
 0x162   : > { %p602_p0 = pnand %p601_p8, %p597_p11 }
 0x164   : > { %605 = shalt.err (!%p602_p0)
}
 0x165   : > { %s683_s23 = smov 128   ;;  %s684_s24 = smov 8  }
 0x166   : > { %471 = dma.vmem_to_hbm [thread:$0]  (%p760_p9), %s809_s18, 256, %s814_s20, %s344_s30, %s683_s23, %s683_s23, %s684_s24  }
 0x167 PF: > { %p482_p2 = scmp.ge.s32.totalorder %s676_s13, 2  ;;  %s374_s28 = sand.u32 1, %s648_s6  }
 0x168   : > { %s375_s29 = scalar_lea.sflag [#allocation6], %s374_s28 }
 0x169   : > { %p478_p4 = pnand %p482_p2, %p766_p12 }
 0x16b   : > { %p479_p5 = pneg %p478_p4 }
 0x16d   : > { %643 = dma.done.wait (%p479_p5), %s375_s29, 256  }
 0x16e   : > { %645 = vsyncadd (%p479_p5), %s375_s29, 4294967040  ;;  %s17_s13 = sadd.s32 1, %s676_s13   ;;  %s875_s6 = smov %s652_s7 }
 0x16f   : > { %p14_p3 = scmp.ge.s32.totalorder %s17_s13, 6   ;;  %s876_s7 = smov %s656_s8 }
 0x170   : > { %s877_s8 = smov %s773_s27  ;;  %s878_s9 = smov %s668_s11 }
 0x171   : > { %s879_s10 = smov %s672_s12  ;;  %s880_s11 = smov %s883_s16 }
 0x172   : > { %s881_s12 = smov %s887_s17  ;;  %16 = sbr.rel (!%p14_p3) target bundleno = 7 (0x7), region = 81 }
 0x177   :  { %380 = vsyncpa [#allocation5], 1 }
 0x178   :  { %382 = vsyncpa [#allocation5 + $0x1], 1 }
 0x179   :  { %383 = vsyncpa [#allocation6], 1 }
 0x17a   :  { %385 = vsyncpa [#allocation6 + $0x1], 1 }

</bundles_post_ra>
